<compile_context>
chip_gen: v7x
topology: tpu7x:2x2x1
jax: 0.10.0
libtpu: 0.0.40
codegen_flags: <defaults>
</compile_context>

<pallas_src>
import jax
import jax.numpy as jnp
from jax import lax
from jax.experimental import pallas as pl
from jax.experimental.pallas import tpu as pltpu

_LANES = 128
_MATS_PER_ROW = _LANES // 4          # 32 matrices (4 components each) per row


def _cdiv(a: int, b: int) -> int:
    return -(-a // b)


def _round_up(a: int, m: int) -> int:
    return _cdiv(a, m) * m


# -----------------------------------------------------------------------------
# One-off probe: which lane phase (lane % 4) holds the determinant after the
# 3-roll de-interleave.  Depends only on pltpu.roll's rotate direction, so it
# is probed once with a tiny kernel and cached as a Python int.
# -----------------------------------------------------------------------------
_DET_LANE_PHASE = None


def _roll_probe_kernel(x_ref, o_ref):
    o_ref[...] = pltpu.roll(x_ref[...], 1, 1)


def _det_lane_phase() -> int:
    global _DET_LANE_PHASE
    if _DET_LANE_PHASE is None:
        iota = lax.broadcasted_iota(jnp.int32, (8, _LANES), 1)
        rolled = pl.pallas_call(
            _roll_probe_kernel,
            out_shape=jax.ShapeDtypeStruct((8, _LANES), jnp.int32),
        )(iota)
        v = int(jax.device_get(rolled)[0, 0])
        if v == 1:                  # roll pulled lane i+1 into lane i
            _DET_LANE_PHASE = 0     # d = x*r3 - r1*r2 lands on lanes 4k
        elif v == _LANES - 1:       # jnp.roll semantics: lane i-1 into lane i
            _DET_LANE_PHASE = 3     # d lands on lanes 4k+3
        else:
            raise RuntimeError(f"unexpected pltpu.roll probe value: {v}")
    return _DET_LANE_PHASE


# -----------------------------------------------------------------------------
# Main streaming-reduction kernel.
# -----------------------------------------------------------------------------
def _make_det_kernel(rows_valid: int, tr: int, chunk: int):
    n_chunks = tr // chunk

    def kernel(x_ref, o_ref):
        # x_ref: (tr, 128) native dtype, lane-interleaved [m00,m01,m10,m11]*32
        # o_ref: (8, 128) f32 per-core partial accumulator (squeezed block)
        i = pl.program_id(1)

        @pl.when(i == 0)
        def _init():
            o_ref[...] = jnp.zeros_like(o_ref)

        block = pl.program_id(0) * pl.num_programs(1) + i
        start_row = block * tr

        def chunk_sq(k):
            r0 = pl.multiple_of(k * chunk, chunk)
            x = x_ref[pl.ds(r0, chunk), :].astype(jnp.float32)   # (chunk, 128)
            r1 = pltpu.roll(x, 1, 1)
            r2 = pltpu.roll(x, 2, 1)
            r3 = pltpu.roll(x, 3, 1)
            e = x * r3 - r1 * r2 - 1.0      # (det - 1) on one lane phase
            return r0, e * e

        def full_body(k, acc):
            _, sq = chunk_sq(k)
            return acc + sq.reshape(chunk // 8, 8, _LANES).sum(axis=0)

        def masked_body(k, acc):
            r0, sq = chunk_sq(k)
            row = lax.broadcasted_iota(jnp.int32, (chunk, _LANES), 0)
            row = row + (start_row + r0)
            sq = jnp.where(row < rows_valid, sq, 0.0)            # true select
            return acc + sq.reshape(chunk // 8, 8, _LANES).sum(axis=0)

        zero = jnp.zeros((8, _LANES), jnp.float32)
        full = start_row + tr <= rows_valid

        @pl.when(full)
        def _acc_full():
            o_ref[...] += lax.fori_loop(0, n_chunks, full_body, zero)

        @pl.when(jnp.logical_not(full))   # ragged / clamped boundary block only
        def _acc_ragged():
            o_ref[...] += lax.fori_loop(0, n_chunks, masked_body, zero)

    return kernel


# -----------------------------------------------------------------------------
# Wrapper
# -----------------------------------------------------------------------------
def _det_loss_jnp(matrices: jax.Array) -> jax.Array:
    m = matrices.astype(jnp.float32)
    det = m[:, 0, 0] * m[:, 1, 1] - m[:, 0, 1] * m[:, 1, 0]
    return jnp.sqrt(jnp.sum(jnp.square(det - 1.0)))


def _default_core_splits() -> int:
    # Two TensorCores share the chip HBM on v7x; single TensorCore otherwise.
    try:
        kind = jax.devices()[0].device_kind.lower()
    except Exception:
        return 1
    return 2 if ("v7" in kind or "7x" in kind) else 1


def determinant_loss(matrices: jax.Array,
                     *,
                     block_rows: int = 16384,          # 8 MiB f32 per block
                     num_core_splits: int | None = None,
                     min_pallas_batch: int = 2048,
                     vmem_limit_bytes: int = 32 * 1024 * 1024) -> jax.Array:
    """matrices: [B, 2, 2] -> scalar float32 loss = sqrt(sum((det - 1)^2))."""
    B = matrices.shape[0]
    assert matrices.shape[1:] == (2, 2), matrices.shape

    # Tiny batches (launch overhead dominates) and batches without a free
    # (rows, 128) bitcast view (B % 32 != 0) use the trivially-fused XLA path,
    # which also reads the data exactly once.  Everything else streams through
    # Pallas with zero extra HBM passes (no pad copy, no f32-cast copy).
    if B < min_pallas_batch or B % _MATS_PER_ROW != 0:
        return _det_loss_jnp(matrices)

    rows = B // _MATS_PER_ROW
    x = matrices.reshape(rows, _LANES)                 # free view, native dtype

    nc = int(num_core_splits) if num_core_splits is not None else _default_core_splits()
    nc = max(1, nc)
    if rows < nc * 8:
        nc = 1

    itemsize = jnp.dtype(x.dtype).itemsize
    sub = {4: 8, 2: 16, 1: 32}.get(itemsize, 8)        # sublane multiple per dtype
    chunk0 = max(64, sub)                              # register-resident chunk

    tr = min(int(block_rows), _cdiv(rows, nc))
    tr = _round_up(max(tr, sub), sub)
    if tr >= chunk0:
        tr = _round_up(tr, chunk0)
        chunk = chunk0
    else:
        chunk = tr

    steps = _cdiv(rows, nc * tr)
    last_block = _cdiv(rows, tr) - 1                   # last block with valid rows

    partials = pl.pallas_call(
        _make_det_kernel(rows, tr, chunk),
        out_shape=jax.ShapeDtypeStruct((nc, 8, _LANES), jnp.float32),
        grid_spec=pltpu.PrefetchScalarGridSpec(
            num_scalar_prefetch=0,
            grid=(nc, steps),
            in_specs=[pl.BlockSpec(
                (tr, _LANES),
                # Clamp so no block is ever fully out of range; the kernel
                # masks any clamped / ragged boundary block from program ids.
                lambda c, i, _s=steps, _lb=last_block:
                    (jnp.minimum(c * _s + i, _lb), 0))],
            out_specs=pl.BlockSpec((None, 8, _LANES), lambda c, i: (c, 0, 0)),
        ),
        compiler_params=pltpu.CompilerParams(
            dimension_semantics=("parallel", "arbitrary"),
            vmem_limit_bytes=int(vmem_limit_bytes)),
    )(x)

    # Final (tiny) reduce: pick the lane phase that carries the determinants,
    # sum the per-core/per-lane partials, sqrt.  Other lane phases hold
    # garbage partials and are simply dropped (they never mixed with these).
    phase = _det_lane_phase()
    return jnp.sqrt(jnp.sum(partials[:, :, phase::4]))


if __name__ == "__main__":
    key = jax.random.PRNGKey(0)
    k1, k2, k3, k4 = jax.random.split(key, 4)

    # 1) Small batch, single partially-filled block: exercises the in-kernel
    #    ragged-row masking (no padding copy anywhere).
    B1 = 96
    m1 = jax.random.normal(k1, (B1, 2, 2), dtype=jnp.float32)
    l1 = determinant_loss(m1, min_pallas_batch=0)
    jax.block_until_ready(l1)
    r1 = _det_loss_jnp(m1)
    assert jnp.allclose(l1, r1, rtol=1e-3, atol=1e-4), (l1, r1)

    # 2) Multi-step grid + ragged last block (127 rows, 16-row blocks).
    B2 = 4064
    m2 = jax.random.normal(k2, (B2, 2, 2), dtype=jnp.float32)
    l2 = determinant_loss(m2, min_pallas_batch=0, block_rows=16)
    jax.block_until_ready(l2)
    r2 = _det_loss_jnp(m2)
    assert jnp.allclose(l2, r2, rtol=1e-3, atol=1e-3), (l2, r2)

    # 3) Native bf16 input: no wrapper-side f32 copy, upcast happens in-kernel.
    B3 = 2048
    m3 = jax.random.normal(k3, (B3, 2, 2), dtype=jnp.float32).astype(jnp.bfloat16)
    l3 = determinant_loss(m3, min_pallas_batch=0)
    jax.block_until_ready(l3)
    r3 = _det_loss_jnp(m3)
    assert jnp.allclose(l3, r3, rtol=2e-3, atol=2e-3), (l3, r3)

    # 4) B not a multiple of 32 / tiny batch -> fused jnp fallback path.
    B4 = 7
    m4 = jax.random.normal(k4, (B4, 2, 2), dtype=jnp.float32)
    l4 = determinant_loss(m4)
    jax.block_until_ready(l4)
    r4 = _det_loss_jnp(m4)
    assert jnp.allclose(l4, r4, rtol=1e-5, atol=1e-6), (l4, r4)

    print("KERNEL_OK")
</pallas_src>

<mosaic_0001>
module attributes {stable_mosaic.version = 11 : i64} {
  func.func @kernel(%arg0: i32, %arg1: i32, %arg2: memref<8x128xf32, #tpu.memory_space<vmem>>, %arg3: memref<1x8x128xf32, #tpu.memory_space<vmem>>) attributes {dimension_semantics = [#tpu.dimension_semantics<parallel>, #tpu.dimension_semantics<arbitrary>], iteration_bounds = array<i64: 1, 1>, scalar_prefetch = 0 : i64, scratch_operands = 0 : i64, tpu.core_type = #tpu.core_type<tc>, window_params = [{transform_indices = @transform_0, window_bounds = array<i64: 8, 128>}, {transform_indices = @transform_1, window_bounds = array<i64: 1, 8, 128>}]} {
    %c0_i32 = arith.constant 0 : i32
    %0 = arith.cmpi eq, %arg1, %c0_i32 : i32
    %1 = arith.extui %0 : i1 to i32
    %c0_i32_0 = arith.constant 0 : i32
    %2 = arith.cmpi ne, %1, %c0_i32_0 : i32
    scf.if %2 {
      %cst_4 = arith.constant 0.000000e+00 : f32
      %14 = vector.broadcast %cst_4 : f32 to vector<8x128xf32>
      %c0 = arith.constant 0 : index
      %c0_5 = arith.constant 0 : index
      %c0_6 = arith.constant 0 : index
      %15 = vector.load %arg3[%c0, %c0_5, %c0_6] : memref<1x8x128xf32, #tpu.memory_space<vmem>>, vector<1x8x128xf32>
      %16 = vector.shape_cast %15 : vector<1x8x128xf32> to vector<8x128xf32>
      %17 = vector.shape_cast %14 : vector<8x128xf32> to vector<1x8x128xf32>
      tpu.vector_store %arg3[%c0, %c0_5, %c0_6], %17 {strides = array<i32>} : memref<1x8x128xf32, #tpu.memory_space<vmem>>, vector<1x8x128xf32>,
    } else {
    }
    %c1_i32 = arith.constant 1 : i32
    %3 = arith.muli %arg0, %c1_i32 : i32
    %4 = arith.addi %3, %arg1 : i32
    %c8_i32 = arith.constant 8 : i32
    %5 = arith.muli %4, %c8_i32 : i32
    %cst = arith.constant 0.000000e+00 : f32
    %6 = vector.broadcast %cst : f32 to vector<8x128xf32>
    %c8_i32_1 = arith.constant 8 : i32
    %7 = arith.addi %5, %c8_i32_1 : i32
    %c3_i32 = arith.constant 3 : i32
    %8 = arith.cmpi sle, %7, %c3_i32 : i32
    %9 = arith.extui %8 : i1 to i32
    %c0_i32_2 = arith.constant 0 : i32
    %10 = arith.cmpi ne, %9, %c0_i32_2 : i32
    scf.if %10 {
      %c0 = arith.constant 0 : index
      %c0_4 = arith.constant 0 : index
      %c0_5 = arith.constant 0 : index
      %14 = vector.load %arg3[%c0, %c0_4, %c0_5] : memref<1x8x128xf32, #tpu.memory_space<vmem>>, vector<1x8x128xf32>
      %15 = vector.shape_cast %14 : vector<1x8x128xf32> to vector<8x128xf32>
      %c0_i32_6 = arith.constant 0 : i32
      %c8_i32_7 = arith.constant 8 : i32
      %16 = arith.muli %c0_i32_6, %c8_i32_7 : i32
      %17 = tpu.assume_multiple %16, 8 : i32
      %18 = arith.index_cast %17 : i32 to index
      %c0_8 = arith.constant 0 : index
      %19 = vector.load %arg2[%18, %c0_8] : memref<8x128xf32, #tpu.memory_space<vmem>>, vector<8x128xf32>
      %c1_i32_9 = arith.constant 1 : i32
      %20 = tpu.dynamic_rotate %19 by %c1_i32_9 dim 1 : vector<8x128xf32>, i32 -> vector<8x128xf32>
      %c2_i32 = arith.constant 2 : i32
      %21 = tpu.dynamic_rotate %19 by %c2_i32 dim 1 : vector<8x128xf32>, i32 -> vector<8x128xf32>
      %c3_i32_10 = arith.constant 3 : i32
      %22 = tpu.dynamic_rotate %19 by %c3_i32_10 dim 1 : vector<8x128xf32>, i32 -> vector<8x128xf32>
      %23 = arith.mulf %19, %22 : vector<8x128xf32>
      %24 = arith.mulf %20, %21 : vector<8x128xf32>
      %25 = arith.subf %23, %24 : vector<8x128xf32>
      %cst_11 = arith.constant 1.000000e+00 : f32
      %26 = vector.broadcast %cst_11 : f32 to vector<8x128xf32>
      %27 = arith.subf %25, %26 : vector<8x128xf32>
      %28 = arith.mulf %27, %27 : vector<8x128xf32>
      %29 = vector.shape_cast %28 : vector<8x128xf32> to vector<1x8x128xf32>
      %cst_12 = arith.constant dense<0.000000e+00> : vector<8x128xf32>
      %30 = vector.multi_reduction <add>, %29, %cst_12 [0] : vector<1x8x128xf32> to vector<8x128xf32>
      %31 = arith.addf %6, %30 : vector<8x128xf32>
      %c1_i32_13 = arith.constant 1 : i32
      %32 = arith.addf %15, %31 : vector<8x128xf32>
      %c0_14 = arith.constant 0 : index
      %c0_15 = arith.constant 0 : index
      %c0_16 = arith.constant 0 : index
      %33 = vector.load %arg3[%c0_14, %c0_15, %c0_16] : memref<1x8x128xf32, #tpu.memory_space<vmem>>, vector<1x8x128xf32>
      %34 = vector.shape_cast %33 : vector<1x8x128xf32> to vector<8x128xf32>
      %35 = vector.shape_cast %32 : vector<8x128xf32> to vector<1x8x128xf32>
      tpu.vector_store %arg3[%c0_14, %c0_15, %c0_16], %35 {strides = array<i32>} : memref<1x8x128xf32, #tpu.memory_space<vmem>>, vector<1x8x128xf32>,
    } else {
    }
    %true = arith.constant true
    %11 = arith.xori %8, %true : i1
    %12 = arith.extui %11 : i1 to i32
    %c0_i32_3 = arith.constant 0 : i32
    %13 = arith.cmpi ne, %12, %c0_i32_3 : i32
    scf.if %13 {
      %c0 = arith.constant 0 : index
      %c0_4 = arith.constant 0 : index
      %c0_5 = arith.constant 0 : index
      %14 = vector.load %arg3[%c0, %c0_4, %c0_5] : memref<1x8x128xf32, #tpu.memory_space<vmem>>, vector<1x8x128xf32>
      %15 = vector.shape_cast %14 : vector<1x8x128xf32> to vector<8x128xf32>
      %c0_i32_6 = arith.constant 0 : i32
      %c8_i32_7 = arith.constant 8 : i32
      %16 = arith.muli %c0_i32_6, %c8_i32_7 : i32
      %17 = tpu.assume_multiple %16, 8 : i32
      %18 = arith.index_cast %17 : i32 to index
      %c0_8 = arith.constant 0 : index
      %19 = vector.load %arg2[%18, %c0_8] : memref<8x128xf32, #tpu.memory_space<vmem>>, vector<8x128xf32>
      %c1_i32_9 = arith.constant 1 : i32
      %20 = tpu.dynamic_rotate %19 by %c1_i32_9 dim 1 : vector<8x128xf32>, i32 -> vector<8x128xf32>
      %c2_i32 = arith.constant 2 : i32
      %21 = tpu.dynamic_rotate %19 by %c2_i32 dim 1 : vector<8x128xf32>, i32 -> vector<8x128xf32>
      %c3_i32_10 = arith.constant 3 : i32
      %22 = tpu.dynamic_rotate %19 by %c3_i32_10 dim 1 : vector<8x128xf32>, i32 -> vector<8x128xf32>
      %23 = arith.mulf %19, %22 : vector<8x128xf32>
      %24 = arith.mulf %20, %21 : vector<8x128xf32>
      %25 = arith.subf %23, %24 : vector<8x128xf32>
      %cst_11 = arith.constant 1.000000e+00 : f32
      %26 = vector.broadcast %cst_11 : f32 to vector<8x128xf32>
      %27 = arith.subf %25, %26 : vector<8x128xf32>
      %28 = arith.mulf %27, %27 : vector<8x128xf32>
      %29 = tpu.iota {dimensions = array<i32: 0>} : vector<8x128xi32>
      %30 = arith.addi %5, %17 : i32
      %31 = vector.broadcast %30 : i32 to vector<8x128xi32>
      %32 = arith.addi %29, %31 : vector<8x128xi32>
      %c3_i32_12 = arith.constant 3 : i32
      %33 = vector.broadcast %c3_i32_12 : i32 to vector<8x128xi32>
      %34 = arith.cmpi slt, %32, %33 : vector<8x128xi32>
      %cst_13 = arith.constant 0.000000e+00 : f32
      %35 = vector.broadcast %cst_13 : f32 to vector<8x128xf32>
      %36 = arith.select %34, %28, %35 : vector<8x128xi1>, vector<8x128xf32>
      %37 = vector.shape_cast %36 : vector<8x128xf32> to vector<1x8x128xf32>
      %cst_14 = arith.constant dense<0.000000e+00> : vector<8x128xf32>
      %38 = vector.multi_reduction <add>, %37, %cst_14 [0] : vector<1x8x128xf32> to vector<8x128xf32>
      %39 = arith.addf %6, %38 : vector<8x128xf32>
      %c1_i32_15 = arith.constant 1 : i32
      %40 = arith.addf %15, %39 : vector<8x128xf32>
      %c0_16 = arith.constant 0 : index
      %c0_17 = arith.constant 0 : index
      %c0_18 = arith.constant 0 : index
      %41 = vector.load %arg3[%c0_16, %c0_17, %c0_18] : memref<1x8x128xf32, #tpu.memory_space<vmem>>, vector<1x8x128xf32>
      %42 = vector.shape_cast %41 : vector<1x8x128xf32> to vector<8x128xf32>
      %43 = vector.shape_cast %40 : vector<8x128xf32> to vector<1x8x128xf32>
      tpu.vector_store %arg3[%c0_16, %c0_17, %c0_18], %43 {strides = array<i32>} : memref<1x8x128xf32, #tpu.memory_space<vmem>>, vector<1x8x128xf32>,
    } else {
    }
    return
  }
  func.func @transform_0(%arg0: i32, %arg1: i32) -> (i32, i32) {
    %c1_i32 = arith.constant 1 : i32
    %0 = arith.muli %arg0, %c1_i32 : i32
    %1 = arith.addi %0, %arg1 : i32
    %c0_i32 = arith.constant 0 : i32
    %2 = arith.minsi %1, %c0_i32 : i32
    %c0_i32_0 = arith.constant 0 : i32
    %c0_i32_1 = arith.constant 0 : i32
    return %2, %c0_i32_0 : i32, i32
  }
  func.func @transform_1(%arg0: i32, %arg1: i32) -> (i32, i32, i32) {
    %c0_i32 = arith.constant 0 : i32
    %c0_i32_0 = arith.constant 0 : i32
    %c0_i32_1 = arith.constant 0 : i32
    return %arg0, %c0_i32, %c0_i32_0 : i32, i32, i32
  }
}

</mosaic_0001>

<bundles_post_ra>
// kernel: tpu_custom_call.1
= control target key start
LH: loop header
LB: loop body
LE: loop exit
PB: predicated region body
PF: predicated region fallthrough
CT: control target
= control target key end

     0   :  { %6 = vsyncpa [#allocation3], 0  ;;  %s212_s0 = inlined_call_operand.hbm [shape: f32[3,128], index: 0, kind: input, shape index: {}]   ;;  %s213_s1 = inlined_call_operand.hbm [shape: f32[1,8,128], index: 1, kind: output, shape index: {}]  }
   0x1   :  { %7 = vsyncpa [#allocation4], 0 }
   0x2   :  { %18 = vsyncadd [#allocation3], 64  ;;  %s171_s6 = smov [#allocation2]   ;;  %s123_s10 = scalar_lea.hbm %s212_s0, 64 }
   0x3   :  { %s23_s7 = sshll.u32 %s171_s6, 4  ;;  %p124_p0 = scmp.ne.s32.totalorder %s212_s0, %s123_s10  ;;  %s24_s7 = int_to_ptr.vmem [resolvable:$true] %s23_s7 }
   0x4   :  { %p127_p1 = scmp.lt.u32.totalorder %s123_s10, %s212_s0 }
   0x6   :  { %p129_p2 = pnand %p127_p1, %p124_p0 }
   0x8   :  { %132 = shalt.err (!%p129_p2)
}
   0x9   :  { %s133_s15 = scalar_lea.vmem %s24_s7, 64  ;;  %s137_s16 = scalar_lea.vmem %s24_s7, 128 }
   0xa   :  { %p134_p3 = scmp.ne.s32.totalorder %s24_s7, %s133_s15  ;;  %p138_p4 = scmp.lt.s32.totalorder %s24_s7, %s24_s7 }
   0xb   :  { %p139_p5 = scmp.lt.s32.totalorder %s137_s16, %s133_s15 }
   0xd   :  { %p140_p6 = por %p139_p5, %p138_p4 }
   0xf   :  { %p141_p7 = pnand %p140_p6, %p134_p3 }
  0x11   :  { %144 = shalt.err (!%p141_p7)
}
  0x12   :  { %s172_s17 = smov 64   ;;  %s173_s18 = smov 4  }
  0x13   :  { %29 = dma.hbm_to_vmem [thread:$0]  %s212_s0, 64, %s24_s7, [#allocation3], %s172_s17, %s172_s17, %s173_s18  }
  0x14   :  { %167 = dma.done.wait [#allocation3], 128  }
  0x15   :  { %168 = vsyncadd [#allocation3], 4294967168  ;;  %v73_v0 = vld [vmem:[#allocation2] sm:$0xff]  ;;  %s174_s21 = smov 1   ;;  %s175_s22 = smov 3   ;;  %v85_v3 = vlaneseq }
  0x16   :  { %74 = vrot.lane.b32.xlu0 %v73_v0, %s174_s21  ;;  %78 = vrot.lane.b32.xlu1 %v73_v0, %s175_s22  ;;  %s176_s23 = smov 2   ;;  %s177_s0 = smov [#allocation5]  }
  0x17   :  { %v86_v7 = vshrl.u32 %v85_v3, 7  ;;  %s102_s24 = sshll.u32 %s177_s0, 4  ;;  %s103_s24 = int_to_ptr.vmem [resolvable:$true] %s102_s24 }
  0x18   :  { %s145_s25 = scalar_lea.vmem %s103_s24, 128  ;;  %p150_p9 = scmp.lt.s32.totalorder %s103_s24, %s103_s24 }
  0x19   :  { %vm90_vm0 = vcmp.lt.s32.totalorder %v86_v7, 3  ;;  %p146_p8 = scmp.ne.s32.totalorder %s103_s24, %s145_s25  ;;  %p151_p10 = scmp.lt.s32.totalorder %s145_s25, %s145_s25 }
  0x1a   :  { %76 = vrot.lane.b32.xlu0 %v73_v0, %s176_s23 }
  0x1b   :  { %p152_p11 = por %p151_p10, %p150_p9 }
  0x1d   :  { %p153_p12 = pnand %p152_p11, %p146_p8 }
  0x88   :  { %v75_v1 = vpop.permute.xlu0 %74  ;;  %v79_v2 = vpop.permute.xlu1 %78 }
  0x89   :  { %v80_v4 = vmul.f32 %v79_v2, %v73_v0 }
  0x8c   :  { %v77_v5 = vpop.permute.xlu0 %76 }
  0x8d   :  { %v81_v6 = vmul.f32 %v77_v5, %v75_v1 }
  0x8f   :  { %v82_v8 = vsub.f32 %v80_v4, %v81_v6 }
  0x91   :  { %v114_v9 = vadd.f32 -1.0, %v82_v8 }
  0x93   :  { %v84_v10 = vmul.f32 %v114_v9, %v114_v9 }
  0x95   :  { %v91_v11 = vsel %vm90_vm0, %v84_v10, 0.0 }
  0x96   :  { %95 = vst [vmem:[#allocation5] sm:$0xff] %v91_v11 }
  0x97   :  { %156 = shalt.err (!%p153_p12)
}
  0x98   :  { %s157_s28 = scalar_lea.hbm %s213_s1, 128 }
  0x99   :  { %p158_p13 = scmp.ne.s32.totalorder %s213_s1, %s157_s28  ;;  %p161_p0 = scmp.lt.u32.totalorder %s157_s28, %s213_s1 }
  0x9b   :  { %p163_p1 = pnand %p161_p0, %p158_p13 }
  0x9d   :  { %166 = shalt.err (!%p163_p1)
}
  0x9e   :  { %105 = dma.vmem_to_hbm [thread:$0]  %s103_s24, 128, %s213_s1, [#allocation4]  }
  0x9f   :  { %169 = dma.done.wait [#allocation4], 128  }
  0xa0   :  { %170 = vsyncadd [#allocation4], 4294967168 }
  0xa1   :  { %109 = vsyncpa [#allocation3], 1 }
  0xa2   :  { %110 = vsyncpa [#allocation4], 1 }

</bundles_post_ra>
